<compile_context>
chip_gen: v7x
topology: tpu7x:2x2x1
jax: 0.10.0
libtpu: 0.0.40
codegen_flags: <defaults>
</compile_context>

<pallas_src>
import functools

import jax
import jax.numpy as jnp
from jax import lax
from jax.experimental import pallas as pl
from jax.experimental.pallas import tpu as pltpu

K_ITERS = 10
ALPHA = 0.1
LANE = 128
SUBLANE = 8


def _round_up(x, m):
    return (x + m - 1) // m * m


def appnp_kernel(x_ref, w1_ref, b1_ref, w2_ref, b2_ref, a_ref, out_ref, *,
                 num_classes):
    # x: [Np, Fp] f32, w1: [Fp, Hp] f32, b1: [1, Hp] f32,
    # w2: [Hp, Cp] f32, b2: [1, Cp] f32,
    # a: [Np, Np] bf16 (already scaled by (1 - ALPHA)), out: [Np, Cp] f32.
    x = x_ref[...]

    # lin1 + ReLU (dropout is identity in eval mode). Padded hidden cols stay 0.
    h = jnp.dot(x, w1_ref[...], preferred_element_type=jnp.float32) + b1_ref[...]
    h = jnp.maximum(h, 0.0)

    # lin2 -> initial logits z0. Padded class cols are exactly 0.
    z0 = jnp.dot(h, w2_ref[...], preferred_element_type=jnp.float32) + b2_ref[...]

    # APPNP propagation: z_{k+1} = A_scaled @ z_k + alpha * z0
    # (A_scaled = (1 - alpha) * A_hat folded in the wrapper; alpha*z0 hoisted.)
    a = a_ref[...]           # bf16, resident in VMEM across all K iterations
    az0 = ALPHA * z0         # loop-invariant

    def body(_, z):
        # bf16 x bf16 MXU matmul, f32 accumulation keeps the power iteration stable.
        return jnp.dot(a, z.astype(jnp.bfloat16),
                       preferred_element_type=jnp.float32) + az0

    z = lax.fori_loop(0, K_ITERS, body, z0, unroll=True)

    # log_softmax along the class axis; mask padded lanes before max / exp-sum.
    col = lax.broadcasted_iota(jnp.int32, z.shape, 1)
    z = jnp.where(col < num_classes, z, jnp.float32(-1e30))
    m = jnp.max(z, axis=1, keepdims=True)
    s = z - m
    lse = jnp.log(jnp.sum(jnp.exp(s), axis=1, keepdims=True))
    out_ref[...] = s - lse   # lane-dense [Np, Cp] store; wrapper slices [:N, :C]


def appnp_net_forward(x, w1, b1, w2, b2, a_hat):
    n, f = x.shape
    h = w1.shape[1]
    c = w2.shape[1]

    n_pad = max(_round_up(n, SUBLANE), SUBLANE)
    f_pad = max(_round_up(f, LANE), LANE)
    h_pad = max(_round_up(h, LANE), LANE)
    c_pad = max(_round_up(c, LANE), LANE)

    # Zero-pad to lane/sublane-dense shapes (zeros are neutral through the MLP and
    # through A@z since padded rows/cols of A are zero).
    xp = jnp.zeros((n_pad, f_pad), jnp.float32).at[:n, :f].set(x.astype(jnp.float32))
    w1p = jnp.zeros((f_pad, h_pad), jnp.float32).at[:f, :h].set(w1)
    b1p = jnp.zeros((1, h_pad), jnp.float32).at[0, :h].set(b1)
    w2p = jnp.zeros((h_pad, c_pad), jnp.float32).at[:h, :c].set(w2)
    b2p = jnp.zeros((1, c_pad), jnp.float32).at[0, :c].set(b2)

    # Fold the (1 - alpha) teleport damping into A_hat, cast to bf16 (halves bytes
    # read 10x by the propagation loop); matmul accumulates in f32 in-kernel.
    ap = jnp.zeros((n_pad, n_pad), jnp.float32).at[:n, :n].set(a_hat)
    ap = ((1.0 - ALPHA) * ap).astype(jnp.bfloat16)

    # Explicit scoped-VMEM budget: inputs/outputs (double-buffered) + activations.
    in_bytes = (xp.size * 4 + w1p.size * 4 + b1p.size * 4 + w2p.size * 4
                + b2p.size * 4 + ap.size * 2)
    out_bytes = n_pad * c_pad * 4
    act_bytes = n_pad * (h_pad + 4 * c_pad) * 4      # h, z0, az0, z, temporaries
    vmem_limit = int(min(max(2 * (in_bytes + out_bytes) + act_bytes + (2 << 20),
                             32 << 20),
                         64 << 20))

    flops = (2 * n_pad * f_pad * h_pad
             + 2 * n_pad * h_pad * c_pad
             + K_ITERS * 2 * n_pad * n_pad * c_pad)
    cost = pl.CostEstimate(flops=flops,
                           transcendentals=n_pad * c_pad,
                           bytes_accessed=in_bytes + out_bytes)

    full = lambda shp: pl.BlockSpec(shp, lambda i: (0,) * len(shp))
    kernel = functools.partial(appnp_kernel, num_classes=c)

    out = pl.pallas_call(
        kernel,
        out_shape=jax.ShapeDtypeStruct((n_pad, c_pad), jnp.float32),
        grid=(1,),
        in_specs=[
            full((n_pad, f_pad)),
            full((f_pad, h_pad)),
            full((1, h_pad)),
            full((h_pad, c_pad)),
            full((1, c_pad)),
            full((n_pad, n_pad)),
        ],
        out_specs=full((n_pad, c_pad)),
        compiler_params=pltpu.CompilerParams(
            dimension_semantics=("arbitrary",),
            vmem_limit_bytes=vmem_limit,
        ),
        cost_estimate=cost,
    )(xp, w1p, b1p, w2p, b2p, ap)

    return out[:n, :c]


def build_normalized_adj(edge_index, num_nodes):
    """Dense GCN-normalized adjacency with self-loops (glue, plain JAX)."""
    src, dst = edge_index[0], edge_index[1]
    adj = jnp.zeros((num_nodes, num_nodes), jnp.float32)
    # message flows source -> target; aggregation at target row
    adj = adj.at[dst, src].add(1.0)
    adj = jnp.minimum(adj, 1.0)  # dedupe repeated edges
    adj = adj + jnp.eye(num_nodes, dtype=jnp.float32)  # self loops
    deg = jnp.sum(adj, axis=1)
    dinv = jnp.where(deg > 0, lax.rsqrt(deg), 0.0)
    return adj * dinv[:, None] * dinv[None, :]


if __name__ == "__main__":
    key = jax.random.PRNGKey(0)
    k_x, k_e, k_w1, k_b1, k_w2, k_b2 = jax.random.split(key, 6)

    num_nodes = 8
    features = 16
    neurons = 32
    classes = 4
    num_edges = 24

    x = jax.random.normal(k_x, (num_nodes, features), jnp.float32)
    edge_index = jax.random.randint(
        k_e, (2, num_edges), 0, num_nodes, dtype=jnp.int32
    )

    # deterministic synthetic parameters (Linear-like uniform init)
    lim1 = 1.0 / jnp.sqrt(features)
    lim2 = 1.0 / jnp.sqrt(neurons)
    w1 = jax.random.uniform(k_w1, (features, neurons), jnp.float32, -lim1, lim1)
    b1 = jax.random.uniform(k_b1, (neurons,), jnp.float32, -lim1, lim1)
    w2 = jax.random.uniform(k_w2, (neurons, classes), jnp.float32, -lim2, lim2)
    b2 = jax.random.uniform(k_b2, (classes,), jnp.float32, -lim2, lim2)

    a_hat = build_normalized_adj(edge_index, num_nodes)

    out = appnp_net_forward(x, w1, b1, w2, b2, a_hat)
    jax.block_until_ready(out)

    # reference check in plain JAX (full f32; tolerance loosened for bf16 A_hat)
    h_ref = jnp.maximum(x @ w1 + b1, 0.0)
    z = z0 = h_ref @ w2 + b2
    for _ in range(K_ITERS):
        z = (1.0 - ALPHA) * (a_hat @ z) + ALPHA * z0
    ref = jax.nn.log_softmax(z, axis=1)
    assert out.shape == (num_nodes, classes)
    assert jnp.allclose(out, ref, atol=5e-2), "mismatch vs reference"

    print("KERNEL_OK")
</pallas_src>

<mosaic_0001>
module attributes {stable_mosaic.version = 11 : i64} {
  func.func @appnp_kernel(%arg0: i32, %arg1: memref<8x128xf32, #tpu.memory_space<vmem>>, %arg2: memref<128x128xf32, #tpu.memory_space<vmem>>, %arg3: memref<1x128xf32, #tpu.memory_space<vmem>>, %arg4: memref<128x128xf32, #tpu.memory_space<vmem>>, %arg5: memref<1x128xf32, #tpu.memory_space<vmem>>, %arg6: memref<8x8xbf16, #tpu.memory_space<vmem>>, %arg7: memref<8x128xf32, #tpu.memory_space<vmem>>) attributes {dimension_semantics = [#tpu.dimension_semantics<arbitrary>], iteration_bounds = array<i64: 1>, scalar_prefetch = 0 : i64, scratch_operands = 0 : i64, tpu.core_type = #tpu.core_type<tc>, window_params = [{pipeline_mode = #tpu.pipeline_mode<synchronous>, transform_indices = @transform_0, window_bounds = array<i64: 8, 128>}, {pipeline_mode = #tpu.pipeline_mode<synchronous>, transform_indices = @transform_1, window_bounds = array<i64: 128, 128>}, {pipeline_mode = #tpu.pipeline_mode<synchronous>, transform_indices = @transform_2, window_bounds = array<i64: 1, 128>}, {pipeline_mode = #tpu.pipeline_mode<synchronous>, transform_indices = @transform_3, window_bounds = array<i64: 128, 128>}, {pipeline_mode = #tpu.pipeline_mode<synchronous>, transform_indices = @transform_4, window_bounds = array<i64: 1, 128>}, {pipeline_mode = #tpu.pipeline_mode<synchronous>, transform_indices = @transform_5, window_bounds = array<i64: 8, 8>}, {pipeline_mode = #tpu.pipeline_mode<synchronous>, transform_indices = @transform_6, window_bounds = array<i64: 8, 128>}]} {
    %c0 = arith.constant 0 : index
    %c0_0 = arith.constant 0 : index
    %0 = vector.load %arg1[%c0, %c0_0] : memref<8x128xf32, #tpu.memory_space<vmem>>, vector<8x128xf32>
    %c0_1 = arith.constant 0 : index
    %c0_2 = arith.constant 0 : index
    %1 = vector.load %arg2[%c0_1, %c0_2] : memref<128x128xf32, #tpu.memory_space<vmem>>, vector<128x128xf32>
    %cst = arith.constant dense<0.000000e+00> : vector<8x128xf32>
    %2 = tpu.matmul %0, %1, %cst {dimension_numbers = #tpu.dot_dimension_numbers<[1], [0], [0], [1], [0, 0, 1, 1], [], []>} : vector<8x128xf32>, vector<128x128xf32>, vector<8x128xf32> -> vector<8x128xf32>
    %c0_3 = arith.constant 0 : index
    %c0_4 = arith.constant 0 : index
    %3 = vector.load %arg3[%c0_3, %c0_4] : memref<1x128xf32, #tpu.memory_space<vmem>>, vector<1x128xf32>
    %4 = vector.broadcast %3 : vector<1x128xf32> to vector<8x128xf32>
    %5 = arith.addf %2, %4 : vector<8x128xf32>
    %cst_5 = arith.constant 0.000000e+00 : f32
    %6 = vector.broadcast %cst_5 : f32 to vector<8x128xf32>
    %7 = arith.maximumf %5, %6 : vector<8x128xf32>
    %c0_6 = arith.constant 0 : index
    %c0_7 = arith.constant 0 : index
    %8 = vector.load %arg4[%c0_6, %c0_7] : memref<128x128xf32, #tpu.memory_space<vmem>>, vector<128x128xf32>
    %cst_8 = arith.constant dense<0.000000e+00> : vector<8x128xf32>
    %9 = tpu.matmul %7, %8, %cst_8 {dimension_numbers = #tpu.dot_dimension_numbers<[1], [0], [0], [1], [0, 0, 1, 1], [], []>} : vector<8x128xf32>, vector<128x128xf32>, vector<8x128xf32> -> vector<8x128xf32>
    %c0_9 = arith.constant 0 : index
    %c0_10 = arith.constant 0 : index
    %10 = vector.load %arg5[%c0_9, %c0_10] : memref<1x128xf32, #tpu.memory_space<vmem>>, vector<1x128xf32>
    %11 = vector.broadcast %10 : vector<1x128xf32> to vector<8x128xf32>
    %12 = arith.addf %9, %11 : vector<8x128xf32>
    %c0_11 = arith.constant 0 : index
    %c0_12 = arith.constant 0 : index
    %13 = vector.load %arg6[%c0_11, %c0_12] : memref<8x8xbf16, #tpu.memory_space<vmem>>, vector<8x8xbf16>
    %cst_13 = arith.constant 1.000000e-01 : f32
    %14 = vector.broadcast %cst_13 : f32 to vector<8x128xf32>
    %15 = arith.mulf %14, %12 : vector<8x128xf32>
    %c0_i32 = arith.constant 0 : i32
    %16 = arith.truncf %12 : vector<8x128xf32> to vector<8x128xbf16>
    %cst_14 = arith.constant dense<0.000000e+00> : vector<8x128xf32>
    %17 = tpu.matmul %13, %16, %cst_14 {dimension_numbers = #tpu.dot_dimension_numbers<[1], [0], [0], [1], [0, 0, 1, 1], [], []>} : vector<8x8xbf16>, vector<8x128xbf16>, vector<8x128xf32> -> vector<8x128xf32>
    %18 = arith.addf %17, %15 : vector<8x128xf32>
    %c1_i32 = arith.constant 1 : i32
    %19 = arith.truncf %18 : vector<8x128xf32> to vector<8x128xbf16>
    %cst_15 = arith.constant dense<0.000000e+00> : vector<8x128xf32>
    %20 = tpu.matmul %13, %19, %cst_15 {dimension_numbers = #tpu.dot_dimension_numbers<[1], [0], [0], [1], [0, 0, 1, 1], [], []>} : vector<8x8xbf16>, vector<8x128xbf16>, vector<8x128xf32> -> vector<8x128xf32>
    %21 = arith.addf %20, %15 : vector<8x128xf32>
    %c2_i32 = arith.constant 2 : i32
    %22 = arith.truncf %21 : vector<8x128xf32> to vector<8x128xbf16>
    %cst_16 = arith.constant dense<0.000000e+00> : vector<8x128xf32>
    %23 = tpu.matmul %13, %22, %cst_16 {dimension_numbers = #tpu.dot_dimension_numbers<[1], [0], [0], [1], [0, 0, 1, 1], [], []>} : vector<8x8xbf16>, vector<8x128xbf16>, vector<8x128xf32> -> vector<8x128xf32>
    %24 = arith.addf %23, %15 : vector<8x128xf32>
    %c3_i32 = arith.constant 3 : i32
    %25 = arith.truncf %24 : vector<8x128xf32> to vector<8x128xbf16>
    %cst_17 = arith.constant dense<0.000000e+00> : vector<8x128xf32>
    %26 = tpu.matmul %13, %25, %cst_17 {dimension_numbers = #tpu.dot_dimension_numbers<[1], [0], [0], [1], [0, 0, 1, 1], [], []>} : vector<8x8xbf16>, vector<8x128xbf16>, vector<8x128xf32> -> vector<8x128xf32>
    %27 = arith.addf %26, %15 : vector<8x128xf32>
    %c4_i32 = arith.constant 4 : i32
    %28 = arith.truncf %27 : vector<8x128xf32> to vector<8x128xbf16>
    %cst_18 = arith.constant dense<0.000000e+00> : vector<8x128xf32>
    %29 = tpu.matmul %13, %28, %cst_18 {dimension_numbers = #tpu.dot_dimension_numbers<[1], [0], [0], [1], [0, 0, 1, 1], [], []>} : vector<8x8xbf16>, vector<8x128xbf16>, vector<8x128xf32> -> vector<8x128xf32>
    %30 = arith.addf %29, %15 : vector<8x128xf32>
    %c5_i32 = arith.constant 5 : i32
    %31 = arith.truncf %30 : vector<8x128xf32> to vector<8x128xbf16>
    %cst_19 = arith.constant dense<0.000000e+00> : vector<8x128xf32>
    %32 = tpu.matmul %13, %31, %cst_19 {dimension_numbers = #tpu.dot_dimension_numbers<[1], [0], [0], [1], [0, 0, 1, 1], [], []>} : vector<8x8xbf16>, vector<8x128xbf16>, vector<8x128xf32> -> vector<8x128xf32>
    %33 = arith.addf %32, %15 : vector<8x128xf32>
    %c6_i32 = arith.constant 6 : i32
    %34 = arith.truncf %33 : vector<8x128xf32> to vector<8x128xbf16>
    %cst_20 = arith.constant dense<0.000000e+00> : vector<8x128xf32>
    %35 = tpu.matmul %13, %34, %cst_20 {dimension_numbers = #tpu.dot_dimension_numbers<[1], [0], [0], [1], [0, 0, 1, 1], [], []>} : vector<8x8xbf16>, vector<8x128xbf16>, vector<8x128xf32> -> vector<8x128xf32>
    %36 = arith.addf %35, %15 : vector<8x128xf32>
    %c7_i32 = arith.constant 7 : i32
    %37 = arith.truncf %36 : vector<8x128xf32> to vector<8x128xbf16>
    %cst_21 = arith.constant dense<0.000000e+00> : vector<8x128xf32>
    %38 = tpu.matmul %13, %37, %cst_21 {dimension_numbers = #tpu.dot_dimension_numbers<[1], [0], [0], [1], [0, 0, 1, 1], [], []>} : vector<8x8xbf16>, vector<8x128xbf16>, vector<8x128xf32> -> vector<8x128xf32>
    %39 = arith.addf %38, %15 : vector<8x128xf32>
    %c8_i32 = arith.constant 8 : i32
    %40 = arith.truncf %39 : vector<8x128xf32> to vector<8x128xbf16>
    %cst_22 = arith.constant dense<0.000000e+00> : vector<8x128xf32>
    %41 = tpu.matmul %13, %40, %cst_22 {dimension_numbers = #tpu.dot_dimension_numbers<[1], [0], [0], [1], [0, 0, 1, 1], [], []>} : vector<8x8xbf16>, vector<8x128xbf16>, vector<8x128xf32> -> vector<8x128xf32>
    %42 = arith.addf %41, %15 : vector<8x128xf32>
    %c9_i32 = arith.constant 9 : i32
    %43 = arith.truncf %42 : vector<8x128xf32> to vector<8x128xbf16>
    %cst_23 = arith.constant dense<0.000000e+00> : vector<8x128xf32>
    %44 = tpu.matmul %13, %43, %cst_23 {dimension_numbers = #tpu.dot_dimension_numbers<[1], [0], [0], [1], [0, 0, 1, 1], [], []>} : vector<8x8xbf16>, vector<8x128xbf16>, vector<8x128xf32> -> vector<8x128xf32>
    %45 = arith.addf %44, %15 : vector<8x128xf32>
    %46 = tpu.iota {dimensions = array<i32: 1>} : vector<8x128xi32>
    %c4_i32_24 = arith.constant 4 : i32
    %47 = vector.broadcast %c4_i32_24 : i32 to vector<8x128xi32>
    %48 = arith.cmpi slt, %46, %47 : vector<8x128xi32>
    %cst_25 = arith.constant -1.000000e+30 : f32
    %49 = vector.broadcast %cst_25 : f32 to vector<8x128xf32>
    %50 = arith.select %48, %45, %49 : vector<8x128xi1>, vector<8x128xf32>
    %cst_26 = arith.constant dense<0xFF800000> : vector<8xf32>
    %51 = vector.multi_reduction <maximumf>, %50, %cst_26 [1] : vector<8x128xf32> to vector<8xf32>
    %52 = vector.shape_cast %51 : vector<8xf32> to vector<8x1xf32>
    %53 = vector.broadcast %52 : vector<8x1xf32> to vector<8x128xf32>
    %54 = arith.subf %50, %53 : vector<8x128xf32>
    %55 = math.exp %54 : vector<8x128xf32>
    %cst_27 = arith.constant dense<0.000000e+00> : vector<8xf32>
    %56 = vector.multi_reduction <add>, %55, %cst_27 [1] : vector<8x128xf32> to vector<8xf32>
    %57 = vector.shape_cast %56 : vector<8xf32> to vector<8x1xf32>
    %58 = math.log %57 : vector<8x1xf32>
    %59 = vector.broadcast %58 : vector<8x1xf32> to vector<8x128xf32>
    %60 = arith.subf %54, %59 : vector<8x128xf32>
    %c0_28 = arith.constant 0 : index
    %c0_29 = arith.constant 0 : index
    %61 = vector.load %arg7[%c0_28, %c0_29] : memref<8x128xf32, #tpu.memory_space<vmem>>, vector<8x128xf32>
    tpu.vector_store %arg7[%c0_28, %c0_29], %60 {strides = array<i32>} : memref<8x128xf32, #tpu.memory_space<vmem>>, vector<8x128xf32>,
    return
  }
  func.func @transform_0(%arg0: i32) -> (i32, i32) {
    %c0_i32 = arith.constant 0 : i32
    %c0_i32_0 = arith.constant 0 : i32
    %c0_i32_1 = arith.constant 0 : i32
    return %c0_i32, %c0_i32_0 : i32, i32
  }
  func.func @transform_1(%arg0: i32) -> (i32, i32) {
    %c0_i32 = arith.constant 0 : i32
    %c0_i32_0 = arith.constant 0 : i32
    %c0_i32_1 = arith.constant 0 : i32
    return %c0_i32, %c0_i32_0 : i32, i32
  }
  func.func @transform_2(%arg0: i32) -> (i32, i32) {
    %c0_i32 = arith.constant 0 : i32
    %c0_i32_0 = arith.constant 0 : i32
    %c0_i32_1 = arith.constant 0 : i32
    return %c0_i32, %c0_i32_0 : i32, i32
  }
  func.func @transform_3(%arg0: i32) -> (i32, i32) {
    %c0_i32 = arith.constant 0 : i32
    %c0_i32_0 = arith.constant 0 : i32
    %c0_i32_1 = arith.constant 0 : i32
    return %c0_i32, %c0_i32_0 : i32, i32
  }
  func.func @transform_4(%arg0: i32) -> (i32, i32) {
    %c0_i32 = arith.constant 0 : i32
    %c0_i32_0 = arith.constant 0 : i32
    %c0_i32_1 = arith.constant 0 : i32
    return %c0_i32, %c0_i32_0 : i32, i32
  }
  func.func @transform_5(%arg0: i32) -> (i32, i32) {
    %c0_i32 = arith.constant 0 : i32
    %c0_i32_0 = arith.constant 0 : i32
    %c0_i32_1 = arith.constant 0 : i32
    return %c0_i32, %c0_i32_0 : i32, i32
  }
  func.func @transform_6(%arg0: i32) -> (i32, i32) {
    %c0_i32 = arith.constant 0 : i32
    %c0_i32_0 = arith.constant 0 : i32
    %c0_i32_1 = arith.constant 0 : i32
    return %c0_i32, %c0_i32_0 : i32, i32
  }
}

</mosaic_0001>

<bundles_post_ra>
// kernel: tpu_custom_call.1
= control target key start
LH: loop header
LB: loop body
LE: loop exit
PB: predicated region body
PF: predicated region fallthrough
CT: control target
= control target key end

     0   :  { %11 = vsyncpa [#allocation3], 0  ;;  %s1282_s0 = inlined_call_operand.hbm [shape: f32[8,128], index: 0, kind: input, shape index: {}]   ;;  %s1283_s1 = inlined_call_operand.hbm [shape: f32[128,128], index: 1, kind: input, shape index: {}]   ;;  %s1284_s2 = inlined_call_operand.vmem [shape: f32[1,128], index: 2, kind: input, shape index: {}]   ;;  %s1285_s3 = inlined_call_operand.hbm [shape: f32[128,128], index: 3, kind: input, shape index: {}]   ;;  %s1286_s4 = inlined_call_operand.vmem [shape: f32[1,128], index: 4, kind: input, shape index: {}]   ;;  %s1287_s5 = inlined_call_operand.vmem [shape: bf16[8,8], index: 5, kind: input, shape index: {}]   ;;  %s1288_s6 = inlined_call_operand.hbm [shape: f32[8,128], index: 6, kind: output, shape index: {}]  }
   0x1   :  { %12 = vsyncpa [#allocation6], 0 }
   0x2   :  { %13 = vsyncpa [#allocation4], 0  ;;  %s1081_s21 = smov [#allocation5]   ;;  %s987_s25 = scalar_lea.hbm %s1283_s1, 2048 }
   0x3   :  { %s29_s22 = sshll.u32 %s1081_s21, 4  ;;  %p988_p0 = scmp.ne.s32.totalorder %s1283_s1, %s987_s25  ;;  %s30_s22 = int_to_ptr.vmem [resolvable:$true] %s29_s22 }
   0x4   :  { %p991_p1 = scmp.lt.u32.totalorder %s987_s25, %s1283_s1 }
   0x6   :  { %p993_p2 = pnand %p991_p1, %p988_p0 }
   0x8   :  { %996 = shalt.err (!%p993_p2)
}
   0x9   :  { %s997_s30 = scalar_lea.vmem %s30_s22, 2048  ;;  %p1002_p4 = scmp.lt.s32.totalorder %s30_s22, %s30_s22 }
   0xa   :  { %p998_p3 = scmp.ne.s32.totalorder %s30_s22, %s997_s30  ;;  %p1003_p5 = scmp.lt.s32.totalorder %s997_s30, %s997_s30 }
   0xc   :  { %p1004_p6 = por %p1003_p5, %p1002_p4 }
   0xe   :  { %p1005_p7 = pnand %p1004_p6, %p998_p3 }
  0x10   :  { %1008 = shalt.err (!%p1005_p7)
}
  0x11   :  { %s1082_s7 = smov 128   ;;  %s1083_s8 = smov 8  }
  0x12   :  { %35 = dma.hbm_to_vmem [thread:$0]  %s1283_s1, 2048, %s30_s22, [#allocation6], %s1082_s7, %s1082_s7, %s1083_s8  }
  0x13   :  { %s1084_s11 = smov [#allocation2]   ;;  %s1085_s13 = smov [#allocation7]  }
  0x14   :  { %s20_s12 = sshll.u32 %s1084_s11, 4  ;;  %s43_s14 = sshll.u32 %s1085_s13, 4  ;;  %s21_s12 = int_to_ptr.vmem [resolvable:$true] %s20_s12  ;;  %s44_s14 = int_to_ptr.vmem [resolvable:$true] %s43_s14 }
  0x15   :  { %s1009_s17 = scalar_lea.hbm %s1282_s0, 128 }
  0x16   :  { %p1010_p8 = scmp.ne.s32.totalorder %s1282_s0, %s1009_s17  ;;  %p1013_p9 = scmp.lt.u32.totalorder %s1009_s17, %s1282_s0 }
  0x18   :  { %p1015_p10 = pnand %p1013_p9, %p1010_p8 }
  0x1a   :  { %1018 = shalt.err (!%p1015_p10)
}
  0x1b   :  { %s1019_s1 = scalar_lea.vmem %s21_s12, 128  ;;  %p1024_p12 = scmp.lt.s32.totalorder %s21_s12, %s21_s12 }
  0x1c   :  { %p1020_p11 = scmp.ne.s32.totalorder %s21_s12, %s1019_s1  ;;  %p1025_p13 = scmp.lt.s32.totalorder %s1019_s1, %s1019_s1 }
  0x1e   :  { %p1026_p0 = por %p1025_p13, %p1024_p12 }
  0x20   :  { %p1027_p1 = pnand %p1026_p0, %p1020_p11 }
  0x22   :  { %1030 = shalt.err (!%p1027_p1)
}
  0x23   :  { %23 = dma.hbm_to_vmem [thread:$0]  %s1282_s0, 128, %s21_s12, [#allocation3]  }
  0x24   :  { %s1031_s26 = scalar_lea.hbm %s1285_s3, 2048 }
  0x25   :  { %p1032_p2 = scmp.ne.s32.totalorder %s1285_s3, %s1031_s26  ;;  %p1035_p3 = scmp.lt.u32.totalorder %s1031_s26, %s1285_s3 }
  0x27   :  { %p1037_p4 = pnand %p1035_p3, %p1032_p2 }
  0x29   :  { %1040 = shalt.err (!%p1037_p4)
}
  0x2a   :  { %s1041_s9 = scalar_lea.vmem %s44_s14, 2048  ;;  %p1046_p6 = scmp.lt.s32.totalorder %s44_s14, %s44_s14 }
  0x2b   :  { %p1042_p5 = scmp.ne.s32.totalorder %s44_s14, %s1041_s9  ;;  %p1047_p7 = scmp.lt.s32.totalorder %s1041_s9, %s1041_s9 }
  0x2d   :  { %p1048_p8 = por %p1047_p7, %p1046_p6 }
  0x2f   :  { %p1049_p9 = pnand %p1048_p8, %p1042_p5 }
  0x31   :  { %1052 = shalt.err (!%p1049_p9)
}
  0x32   :  { %49 = dma.hbm_to_vmem [thread:$0]  %s1285_s3, 2048, %s44_s14, [#allocation6], %s1082_s7, %s1082_s7, %s1083_s8  }
  0x33   :  { %1075 = dma.done.wait [#allocation3], 128  }
  0x34   :  { %1076 = vsyncadd [#allocation3], 4294967168 }
  0x35   :  { %1077 = dma.done.wait [#allocation6], 4096  }
  0x36   :  { %1078 = vsyncadd [#allocation6], 4294963200  ;;  %v1086_v0 = vmov 0.0|0.0   ;;  %vm1087_vm0 = vmmov 0   ;;  %v1088_v1 = vmov 0.0   ;;  %v65_v2 = vld [vmem:[#allocation5] sm:$0xff] }
  0x37   :  { %926 = vmatprep.subr.bf16.mxu0 %v1086_v0  ;;  %828 = vmatprep.mubr.msk.f32.mxu0 %vm1087_vm0, %v1088_v1  ;;  %v66_v3 = vld [vmem:[#allocation5 + $0x8] sm:$0xff]  ;;  %v67_v4 = vld [vmem:[#allocation5 + $0x10] sm:$0xff]  ;;  %v68_v6 = vld [vmem:[#allocation5 + $0x18] sm:$0xff]  ;;  %vm259_vm1 = vcmask 1043456   ;;  %vm255_vm2 = vcmask 64512  }
  0x38   :  { %950 = vmatprep.subr.bf16.mxu1 %v1086_v0  ;;  %863 = vmatprep.mubr.msk.f32.mxu1 %vm1087_vm0, %v1088_v1  ;;  %v927_v5 = vpack.c.bf16 %v66_v3, %v65_v2  ;;  %v930_v7 = vpack.c.bf16 %v68_v6, %v67_v4  ;;  %v69_v8 = vld [vmem:[#allocation5 + $0x20] sm:$0xff]  ;;  %v70_v9 = vld [vmem:[#allocation5 + $0x28] sm:$0xff]  ;;  %v161_v12 = vld [vmem:[#allocation7 + $0x10] sm:$0xff] }
  0x39   :  { %v159_v10 = vld [vmem:[#allocation7] sm:$0xff]  ;;  %v160_v11 = vld [vmem:[#allocation7 + $0x8] sm:$0xff]  ;;  %v162_v13 = vld [vmem:[#allocation7 + $0x18] sm:$0xff]  ;;  %v933_v14 = vpack.c.bf16 %v70_v9, %v69_v8 }
  0x3a   :  { %928 = vmatpush3.bf16.msra.mxu0 %v927_v5  ;;  %v951_v15 = vpack.c.bf16 %v160_v11, %v159_v10  ;;  %v71_v16 = vld [vmem:[#allocation5 + $0x30] sm:$0xff]  ;;  %v72_v17 = vld [vmem:[#allocation5 + $0x38] sm:$0xff]  ;;  %v954_v18 = vpack.c.bf16 %v162_v13, %v161_v12  ;;  %v163_v19 = vld [vmem:[#allocation7 + $0x20] sm:$0xff] }
  0x3b   :  { %929 = vmatprep.subr.bf16.mxu0 %v1086_v0  ;;  %v164_v20 = vld [vmem:[#allocation7 + $0x28] sm:$0xff]  ;;  %v936_v21 = vpack.c.bf16 %v72_v17, %v71_v16  ;;  %v73_v22 = vld [vmem:[#allocation5 + $0x40] sm:$0xff]  ;;  %v165_v25 = vld [vmem:[#allocation7 + $0x30] sm:$0xff] }
  0x3c   :  { %952 = vmatpush3.bf16.msra.mxu1 %v951_v15  ;;  %v74_v23 = vld [vmem:[#allocation5 + $0x48] sm:$0xff]  ;;  %v957_v24 = vpack.c.bf16 %v164_v20, %v163_v19  ;;  %v166_v26 = vld [vmem:[#allocation7 + $0x38] sm:$0xff]  ;;  %v75_v28 = vld [vmem:[#allocation5 + $0x50] sm:$0xff] }
  0x3d   :  { %953 = vmatprep.subr.bf16.mxu1 %v1086_v0  ;;  %v939_v27 = vpack.c.bf16 %v74_v23, %v73_v22  ;;  %v76_v29 = vld [vmem:[#allocation5 + $0x58] sm:$0xff]  ;;  %v960_v30 = vpack.c.bf16 %v166_v26, %v165_v25  ;;  %v167_v31 = vld [vmem:[#allocation7 + $0x40] sm:$0xff]  ;;  %v168_v32 = vld [vmem:[#allocation7 + $0x48] sm:$0xff] }
  0x3e   :  { %931 = vmatpush3.bf16.msra.mxu0 %v930_v7  ;;  %v942_v33 = vpack.c.bf16 %v76_v29, %v75_v28  ;;  %v77_v34 = vld [vmem:[#allocation5 + $0x60] sm:$0xff]  ;;  %v78_v35 = vld [vmem:[#allocation5 + $0x68] sm:$0xff]  ;;  %v963_v36 = vpack.c.bf16 %v168_v32, %v167_v31  ;;  %v169_v37 = vld [vmem:[#allocation7 + $0x50] sm:$0xff] }
  0x3f   :  { %932 = vmatprep.subr.bf16.mxu0 %v1086_v0  ;;  %v170_v38 = vld [vmem:[#allocation7 + $0x58] sm:$0xff]  ;;  %v945_v39 = vpack.c.bf16 %v78_v35, %v77_v34  ;;  %v79_v40 = vld [vmem:[#allocation5 + $0x70] sm:$0xff]  ;;  %v171_v43 = vld [vmem:[#allocation7 + $0x60] sm:$0xff] }
  0x40   :  { %955 = vmatpush3.bf16.msra.mxu1 %v954_v18  ;;  %v80_v41 = vld [vmem:[#allocation5 + $0x78] sm:$0xff]  ;;  %v966_v42 = vpack.c.bf16 %v170_v38, %v169_v37  ;;  %v172_v44 = vld [vmem:[#allocation7 + $0x68] sm:$0xff]  ;;  %v173_v48 = vld [vmem:[#allocation7 + $0x70] sm:$0xff] }
  0x41   :  { %956 = vmatprep.subr.bf16.mxu1 %v1086_v0  ;;  %v948_v45 = vpack.c.bf16 %v80_v41, %v79_v40  ;;  %v969_v46 = vpack.c.bf16 %v172_v44, %v171_v43  ;;  %v64_v47 = vld [vmem:[#allocation2] sm:$0xff] }
  0x42   :  { %934 = vmatpush3.bf16.msra.mxu0 %v933_v14  ;;  %v174_v49 = vld [vmem:[#allocation7 + $0x78] sm:$0xff] }
  0x43   :  { %935 = vmatprep.subr.bf16.mxu0 %v1086_v0  ;;  %v972_v50 = vpack.c.bf16 %v174_v49, %v173_v48  ;;  %v730_v51 = vld [vmem:[%s1284_s2] ss:$0 sm:$0xff] }
  0x44   :  { %958 = vmatpush3.bf16.msra.mxu1 %v957_v24  ;;  %v731_v56 = vld [vmem:[%s1286_s4] ss:$0 sm:$0xff]  ;;  %s1089_s4 = smov [#allocation8]  }
  0x45   :  { %959 = vmatprep.subr.bf16.mxu1 %v1086_v0  ;;  %v1203_v62 = vld [vmem:[%s1287_s5] sm:$0xf]  ;;  %s720_s5 = sshll.u32 %s1089_s4, 4  ;;  %s721_s5 = int_to_ptr.vmem [resolvable:$true] %s720_s5 }
  0x46   :  { %937 = vmatpush3.bf16.msra.mxu0 %v936_v21  ;;  %s1053_s13 = scalar_lea.vmem %s721_s5, 128  ;;  %p1058_p11 = scmp.lt.s32.totalorder %s721_s5, %s721_s5 }
  0x47   :  { %938 = vmatprep.subr.bf16.mxu0 %v1086_v0  ;;  %p1054_p10 = scmp.ne.s32.totalorder %s721_s5, %s1053_s13  ;;  %p1059_p12 = scmp.lt.s32.totalorder %s1053_s13, %s1053_s13 }
  0x48   :  { %961 = vmatpush3.bf16.msra.mxu1 %v960_v30 }
  0x49   :  { %962 = vmatprep.subr.bf16.mxu1 %v1086_v0  ;;  %p1060_p13 = por %p1059_p12, %p1058_p11 }
  0x4a   :  { %940 = vmatpush3.bf16.msra.mxu0 %v939_v27 }
  0x4b   :  { %941 = vmatprep.subr.bf16.mxu0 %v1086_v0  ;;  %p1061_p0 = pnand %p1060_p13, %p1054_p10 }
  0x4c   :  { %964 = vmatpush3.bf16.msra.mxu1 %v963_v36 }
  0x4d   :  { %965 = vmatprep.subr.bf16.mxu1 %v1086_v0 }
  0x4e   :  { %943 = vmatpush3.bf16.msra.mxu0 %v942_v33 }
  0x4f   :  { %944 = vmatprep.subr.bf16.mxu0 %v1086_v0 }
  0x50   :  { %967 = vmatpush3.bf16.msra.mxu1 %v966_v42 }
  0x51   :  { %968 = vmatprep.subr.bf16.mxu1 %v1086_v0 }
  0x52   :  { %946 = vmatpush3.bf16.msra.mxu0 %v945_v39 }
  0x53   :  { %947 = vmatprep.subr.bf16.mxu0 %v1086_v0 }
  0x54   :  { %970 = vmatpush3.bf16.msra.mxu1 %v969_v46 }
  0x55   :  { %971 = vmatprep.subr.bf16.mxu1 %v1086_v0 }
  0x56   :  { %949 = vmatpush3.bf16.msra.mxu0 %v948_v45 }
  0x57   :  { %866 = vmatprep.subr.bf16.mxu0 %v1088_v1 }
  0x58   :  { %973 = vmatpush3.bf16.msra.mxu1 %v972_v50 }
  0x59   :  { %829 = vmatmul.mubr.f32.vlgmr.msra.gmra.mrb[0].mxu0 %v64_v47  ;;  %872 = vmatprep.subr.bf16.mxu1 %v1088_v1 }
  0x5a   :  { %868 = vmatprep.mubr.msk.bf16.mxu0 %vm1087_vm0, %v1088_v1 }
 0x12c   :  { %v154_v52 = vpop.f32.mrb[0].mxu0 }
 0x12d   :  { %v155_v53 = vadd.f32 %v730_v51, %v154_v52  ;;  %v830_v54 = vpop.f32.mrb[1].mxu0 }
 0x12f   :  { %v158_v55 = vmax.f32 %v155_v53, 0.0 }
 0x131   :  { %864 = vmatmul.mubr.f32.vlgmr.msra.gmra.mrb[0].mxu1 %v158_v55 }
 0x132   :  { %874 = vmatprep.mubr.msk.bf16.mxu1 %vm1087_vm0, %v1088_v1 }
 0x204   :  { %v248_v57 = vpop.f32.mrb[0].mxu1 }
 0x205   :  { %v249_v58 = vadd.f32 %v731_v56, %v248_v57  ;;  %v865_v59 = vpop.f32.mrb[1].mxu1 }
 0x207   :  { %v254_v60 = vpack.c.bf16 %v249_v58, %v249_v58  ;;  %v1210_v63 = vmul.f32 0.1, %v249_v58 }
 0x209   :  { %v261_v61 = vsel %vm259_vm1, %v254_v60, 0 }
 0x20a   :  { %867 = vmatpush3.bf16.msra.mxu0 %v261_v61 }
 0x20b   :  { %878 = vmatprep.subr.bf16.mxu0 %v1088_v1 }
 0x20d   :  { %869 = vmatmul.mubr.msk.bf16.vlgmr.msra.gmra.mrb[4].mxu0 %vm255_vm2, %v1203_v62 }
 0x20e   :  { %880 = vmatprep.mubr.msk.bf16.mxu0 %vm1087_vm0, %v1088_v1 }
 0x2e0   :  { %v297_v0 = vpop.f32.mrb[4].mxu0 }
 0x2e1   :  { %v298_v2 = vadd.f32 %v297_v0, %v1210_v63  ;;  %v870_v3 = vpop.f32.mrb[5].mxu0 }
 0x2e2   :  { %v300_v4 = vpop.f32.mrb[6].mxu0 }
 0x2e3   :  { %v303_v5 = vpack.c.bf16 %v298_v2, %v298_v2  ;;  %v871_v6 = vpop.f32.mrb[7].mxu0  ;;  %v699_v2 = vlaneseq }
 0x2e5   :  { %v305_v7 = vsel %vm259_vm1, %v303_v5, 0  ;;  %v700_v3 = vand.u32 127, %v699_v2 }
 0x2e6   :  { %873 = vmatpush3.bf16.msra.mxu1 %v305_v7 }
 0x2e7   :  { %884 = vmatprep.subr.bf16.mxu1 %v1088_v1  ;;  %vm701_vm3 = vcmp.lt.s32.totalorder %v700_v3, 4 }
 0x2e9   :  { %875 = vmatmul.mubr.msk.bf16.vlgmr.msra.gmra.mrb[4].mxu1 %vm255_vm2, %v1203_v62 }
 0x2ea   :  { %886 = vmatprep.mubr.msk.bf16.mxu1 %vm1087_vm0, %v1088_v1 }
 0x3bc   :  { %v341_v8 = vpop.f32.mrb[4].mxu1 }
 0x3bd   :  { %v342_v9 = vadd.f32 %v341_v8, %v1210_v63  ;;  %v876_v10 = vpop.f32.mrb[5].mxu1 }
 0x3be   :  { %v344_v11 = vpop.f32.mrb[6].mxu1 }
 0x3bf   :  { %v347_v12 = vpack.c.bf16 %v342_v9, %v342_v9  ;;  %v877_v13 = vpop.f32.mrb[7].mxu1 }
 0x3c1   :  { %v349_v14 = vsel %vm259_vm1, %v347_v12, 0 }
 0x3c2   :  { %879 = vmatpush3.bf16.msra.mxu0 %v349_v14 }
 0x3c3   :  { %890 = vmatprep.subr.bf16.mxu0 %v1088_v1 }
 0x3c5   :  { %881 = vmatmul.mubr.msk.bf16.vlgmr.msra.gmra.mrb[8].mxu0 %vm255_vm2, %v1203_v62 }
 0x3c6   :  { %892 = vmatprep.mubr.msk.bf16.mxu0 %vm1087_vm0, %v1088_v1 }
 0x498   :  { %v385_v15 = vpop.f32.mrb[8].mxu0 }
 0x499   :  { %v386_v16 = vadd.f32 %v385_v15, %v1210_v63  ;;  %v882_v17 = vpop.f32.mrb[9].mxu0 }
 0x49a   :  { %v388_v18 = vpop.f32.mrb[10].mxu0 }
 0x49b   :  { %v391_v19 = vpack.c.bf16 %v386_v16, %v386_v16  ;;  %v883_v20 = vpop.f32.mrb[11].mxu0 }
 0x49d   :  { %v393_v21 = vsel %vm259_vm1, %v391_v19, 0 }
 0x49e   :  { %885 = vmatpush3.bf16.msra.mxu1 %v393_v21 }
 0x49f   :  { %896 = vmatprep.subr.bf16.mxu1 %v1088_v1 }
 0x4a1   :  { %887 = vmatmul.mubr.msk.bf16.vlgmr.msra.gmra.mrb[8].mxu1 %vm255_vm2, %v1203_v62 }
 0x4a2   :  { %898 = vmatprep.mubr.msk.bf16.mxu1 %vm1087_vm0, %v1088_v1 }
 0x574   :  { %v429_v22 = vpop.f32.mrb[8].mxu1 }
 0x575   :  { %v430_v23 = vadd.f32 %v429_v22, %v1210_v63  ;;  %v888_v24 = vpop.f32.mrb[9].mxu1 }
 0x576   :  { %v432_v25 = vpop.f32.mrb[10].mxu1 }
 0x577   :  { %v435_v26 = vpack.c.bf16 %v430_v23, %v430_v23  ;;  %v889_v27 = vpop.f32.mrb[11].mxu1 }
 0x579   :  { %v437_v28 = vsel %vm259_vm1, %v435_v26, 0 }
 0x57a   :  { %891 = vmatpush3.bf16.msra.mxu0 %v437_v28 }
 0x57b   :  { %902 = vmatprep.subr.bf16.mxu0 %v1088_v1 }
 0x57d   :  { %893 = vmatmul.mubr.msk.bf16.vlgmr.msra.gmra.mrb[12].mxu0 %vm255_vm2, %v1203_v62 }
 0x57e   :  { %904 = vmatprep.mubr.msk.bf16.mxu0 %vm1087_vm0, %v1088_v1 }
 0x650   :  { %v473_v29 = vpop.f32.mrb[12].mxu0 }
 0x651   :  { %v474_v30 = vadd.f32 %v473_v29, %v1210_v63  ;;  %v894_v31 = vpop.f32.mrb[13].mxu0 }
 0x652   :  { %v476_v32 = vpop.f32.mrb[14].mxu0 }
 0x653   :  { %v479_v33 = vpack.c.bf16 %v474_v30, %v474_v30  ;;  %v895_v34 = vpop.f32.mrb[15].mxu0 }
 0x655   :  { %v481_v35 = vsel %vm259_vm1, %v479_v33, 0 }
 0x656   :  { %897 = vmatpush3.bf16.msra.mxu1 %v481_v35 }
 0x657   :  { %908 = vmatprep.subr.bf16.mxu1 %v1088_v1 }
 0x659   :  { %899 = vmatmul.mubr.msk.bf16.vlgmr.msra.gmra.mrb[12].mxu1 %vm255_vm2, %v1203_v62 }
 0x65a   :  { %910 = vmatprep.mubr.msk.bf16.mxu1 %vm1087_vm0, %v1088_v1 }
 0x72c   :  { %v517_v36 = vpop.f32.mrb[12].mxu1 }
 0x72d   :  { %v518_v37 = vadd.f32 %v517_v36, %v1210_v63  ;;  %v900_v38 = vpop.f32.mrb[13].mxu1 }
 0x72e   :  { %v520_v39 = vpop.f32.mrb[14].mxu1 }
 0x72f   :  { %v523_v40 = vpack.c.bf16 %v518_v37, %v518_v37  ;;  %v901_v41 = vpop.f32.mrb[15].mxu1 }
 0x731   :  { %v525_v42 = vsel %vm259_vm1, %v523_v40, 0 }
 0x732   :  { %903 = vmatpush3.bf16.msra.mxu0 %v525_v42 }
 0x733   :  { %914 = vmatprep.subr.bf16.mxu0 %v1088_v1 }
 0x735   :  { %905 = vmatmul.mubr.msk.bf16.vlgmr.msra.gmra.mrb[16].mxu0 %vm255_vm2, %v1203_v62 }
 0x736   :  { %916 = vmatprep.mubr.msk.bf16.mxu0 %vm1087_vm0, %v1088_v1 }
 0x808   :  { %v561_v43 = vpop.f32.mrb[16].mxu0 }
 0x809   :  { %v562_v44 = vadd.f32 %v561_v43, %v1210_v63  ;;  %v906_v45 = vpop.f32.mrb[17].mxu0 }
 0x80a   :  { %v564_v46 = vpop.f32.mrb[18].mxu0 }
 0x80b   :  { %v567_v47 = vpack.c.bf16 %v562_v44, %v562_v44  ;;  %v907_v48 = vpop.f32.mrb[19].mxu0 }
 0x80d   :  { %v569_v49 = vsel %vm259_vm1, %v567_v47, 0 }
 0x80e   :  { %909 = vmatpush3.bf16.msra.mxu1 %v569_v49 }
 0x80f   :  { %920 = vmatprep.subr.bf16.mxu1 %v1088_v1 }
 0x811   :  { %911 = vmatmul.mubr.msk.bf16.vlgmr.msra.gmra.mrb[16].mxu1 %vm255_vm2, %v1203_v62 }
 0x812   :  { %922 = vmatprep.mubr.msk.bf16.mxu1 %vm1087_vm0, %v1088_v1 }
 0x8e4   :  { %v605_v50 = vpop.f32.mrb[16].mxu1 }
 0x8e5   :  { %v606_v51 = vadd.f32 %v605_v50, %v1210_v63  ;;  %v912_v52 = vpop.f32.mrb[17].mxu1 }
 0x8e6   :  { %v608_v53 = vpop.f32.mrb[18].mxu1 }
 0x8e7   :  { %v611_v54 = vpack.c.bf16 %v606_v51, %v606_v51  ;;  %v913_v55 = vpop.f32.mrb[19].mxu1 }
 0x8e9   :  { %v613_v56 = vsel %vm259_vm1, %v611_v54, 0 }
 0x8ea   :  { %915 = vmatpush3.bf16.msra.mxu0 %v613_v56 }
 0x8ed   :  { %917 = vmatmul.mubr.msk.bf16.vlgmr.msra.gmra.mrb[20].mxu0 %vm255_vm2, %v1203_v62 }
 0x9c0   :  { %v649_v57 = vpop.f32.mrb[20].mxu0 }
 0x9c1   :  { %v650_v58 = vadd.f32 %v649_v57, %v1210_v63  ;;  %v918_v59 = vpop.f32.mrb[21].mxu0 }
 0x9c2   :  { %v652_v60 = vpop.f32.mrb[22].mxu0 }
 0x9c3   :  { %v655_v61 = vpack.c.bf16 %v650_v58, %v650_v58  ;;  %v919_v1 = vpop.f32.mrb[23].mxu0 }
 0x9c5   :  { %v657_v0 = vsel %vm259_vm1, %v655_v61, 0 }
 0x9c6   :  { %921 = vmatpush3.bf16.msra.mxu1 %v657_v0 }
 0x9c9   :  { %923 = vmatmul.mubr.msk.bf16.vlgmr.msra.gmra.mrb[20].mxu1 %vm255_vm2, %v1203_v62 }
 0xa9c   :  { %v693_v4 = vpop.f32.mrb[20].mxu1 }
 0xa9d   :  { %v694_v5 = vadd.f32 %v693_v4, %v1210_v63  ;;  %v924_v6 = vpop.f32.mrb[21].mxu1 }
 0xa9e   :  { %v696_v7 = vpop.f32.mrb[22].mxu1 }
 0xa9f   :  { %v702_v8 = vsel %vm701_vm3, %v694_v5, -1e+30  ;;  %v925_v9 = vpop.f32.mrb[23].mxu1 }
 0xaa0   :  { %703 = vmax.xlane.f32.xlu0 %v702_v8 }
 0xb2d   :  { %v704_v10 = vpop.xlane.xlu0 %703 }
 0xb2e   :  { %v705_v11 = vsub.f32 %v702_v8, %v704_v10 }
 0xb30   :  { %v706_v12 = vmul.f32 1.442695, %v705_v11 }
 0xb32   :  { %983 = vpow2.f32 %v706_v12 }
 0xb3c   :  { %v984_v13 = vpop.eup %983 }
 0xb3d   :  { %708 = vadd.xlane.f32.xlu0 %v984_v13 }
 0xbca   :  { %v709_v14 = vpop.xlane.xlu0 %708 }
 0xbcb   :  { %985 = vlog2.f32 %v709_v14 }
 0xbd5   :  { %v986_v62 = vpop.eup %985 }
 0xbd6   :  { %v711_v15 = vmul.f32 0.6931472, %v986_v62 }
 0xbd8   :  { %v712_v16 = vsub.f32 %v705_v11, %v711_v15 }
 0xbda   :  { %713 = vst [vmem:[#allocation8] sm:$0xff] %v712_v16 }
 0xbdb   :  { %1064 = shalt.err (!%p1061_p0)
}
 0xbdc   :  { %s1065_s16 = scalar_lea.hbm %s1288_s6, 128 }
 0xbdd   :  { %p1066_p1 = scmp.ne.s32.totalorder %s1288_s6, %s1065_s16  ;;  %p1069_p2 = scmp.lt.u32.totalorder %s1065_s16, %s1288_s6 }
 0xbdf   :  { %p1071_p3 = pnand %p1069_p2, %p1066_p1 }
 0xbe1   :  { %1074 = shalt.err (!%p1071_p3)
}
 0xbe2   :  { %723 = dma.vmem_to_hbm [thread:$0]  %s721_s5, 128, %s1288_s6, [#allocation4]  }
 0xbe3   :  { %1079 = dma.done.wait [#allocation4], 128  }
 0xbe4   :  { %1080 = vsyncadd [#allocation4], 4294967168 }
 0xbe5   :  { %727 = vsyncpa [#allocation3], 1 }
 0xbe6   :  { %728 = vsyncpa [#allocation6], 1 }
 0xbe7   :  { %729 = vsyncpa [#allocation4], 1 }

</bundles_post_ra>
